<compile_context>
chip_gen: v6e
topology: v6e:2x2x1
jax: 0.10.0
libtpu: 0.0.40
codegen_flags: <defaults>
</compile_context>

<pallas_src>
import jax
import jax.numpy as jnp
from jax.experimental import pallas as pl
from jax.experimental.pallas import tpu as pltpu

NUM_CLASSES = 2
NUM_ROWS = 10
NUM_COLS = 10
NUM_NODES = NUM_ROWS * NUM_COLS  # 100 — x_to_lat consumes exactly this many entries
F_IN = 4
F_OUT = 3

# Packed scalar layout (SMEM, float32):
#   [0]      bg[0, 0]
#   [1:5]    w1 row-major  (w1[0,0], w1[0,1], w1[1,0], w1[1,1])
#   [5:7]    b1
#   [7:11]   w2 row-major
#   [11:13]  b2
P_LEN = 13


def combined_kernel(x_ref, adj_ref, wg0_ref, p_ref, out_ref):
    x = x_ref[...]        # (BT, N, F_IN) f32
    adj = adj_ref[...]    # (BT, N, N)    f32
    wg0 = wg0_ref[...]    # (1, F_IN)     GCN weight column 0

    # Only column 0 of the GCN output feeds the head (occ_status == bd_info ==
    # data[:, 0]); relu and the bias commute with column extraction, so
    # compute just that column:  col0 = relu(adj @ (x @ Wg[:, 0]) + bg[0, 0]).
    xw0 = jnp.sum(x * wg0[None, :, :], axis=-1)            # (BT, N)  VPU mul + lane reduce

    # Batched matvec adj @ xw0 on VPU/XLU (avoid a 1-wide MXU matmul).
    agg = jnp.sum(adj * xw0[:, None, :], axis=-1)           # (BT, N)
    col0 = jnp.maximum(agg + p_ref[0], 0.0)                 # + bg0, relu

    # transform_batch: mean of the 10x10 lattice built from column 0.
    v = jnp.mean(col0, axis=-1, keepdims=True)              # (BT, 1)

    # fc1 on feats = [v, v]  (y[k] = v*(w1[k,0]+w1[k,1]) + b1[k]) -> relu
    y0 = jnp.maximum(v * (p_ref[1] + p_ref[2]) + p_ref[5], 0.0)
    y1 = jnp.maximum(v * (p_ref[3] + p_ref[4]) + p_ref[6], 0.0)

    # fc2
    z0 = y0 * p_ref[7] + y1 * p_ref[8] + p_ref[11]
    z1 = y0 * p_ref[9] + y1 * p_ref[10] + p_ref[12]

    # softmax over the 2 classes
    m = jnp.maximum(z0, z1)
    e0 = jnp.exp(z0 - m)
    e1 = jnp.exp(z1 - m)
    inv = 1.0 / (e0 + e1)
    out_ref[...] = jnp.concatenate([e0 * inv, e1 * inv], axis=-1)


def combined_model_pool(x_gcn, adjacency, params, block_b=128):
    B, N, Fi = x_gcn.shape
    assert N == NUM_NODES and Fi == F_IN

    # Batch tile: the whole batch if small, otherwise a multiple of 8 (output
    # sublane constraint) that keeps double-buffered (BT, N, N) adjacency tiles
    # well inside scoped VMEM on v5e/v6e/v7x (BT=128 -> ~10 MiB of adj buffers).
    if B <= block_b:
        bt, b_pad = B, B
    else:
        bt = max(8, (block_b // 8) * 8)
        b_pad = -(-B // bt) * bt
        pad = b_pad - B
        if pad:
            x_gcn = jnp.pad(x_gcn, ((0, pad), (0, 0), (0, 0)))
            adjacency = jnp.pad(adjacency, ((0, pad), (0, 0), (0, 0)))

    wg0 = params['wg'][:, 0].reshape(1, F_IN).astype(jnp.float32)
    packed = jnp.concatenate([
        params['bg'][0, 0:1],
        params['w1'].reshape(-1),
        params['b1'].reshape(-1),
        params['w2'].reshape(-1),
        params['b2'].reshape(-1),
    ]).astype(jnp.float32)                                   # (P_LEN,)

    grid = (b_pad // bt,)
    flops = b_pad * N * (2 * Fi + 2 * N) + b_pad * 16
    bytes_accessed = 4 * (b_pad * N * N + b_pad * N * Fi
                          + b_pad * NUM_CLASSES + Fi + P_LEN)

    out = pl.pallas_call(
        combined_kernel,
        out_shape=jax.ShapeDtypeStruct((b_pad, NUM_CLASSES), jnp.float32),
        grid=grid,
        in_specs=[
            pl.BlockSpec((bt, N, Fi), lambda i: (i, 0, 0)),        # x tile
            pl.BlockSpec((bt, N, N), lambda i: (i, 0, 0)),         # adjacency tile
            pl.BlockSpec((1, Fi), lambda i: (0, 0)),               # GCN weight col, resident
            pl.BlockSpec(memory_space=pltpu.MemorySpace.SMEM),      # packed head scalars
        ],
        out_specs=pl.BlockSpec((bt, NUM_CLASSES), lambda i: (i, 0)),
        compiler_params=pltpu.CompilerParams(
            dimension_semantics=("parallel",),
            vmem_limit_bytes=32 * 1024 * 1024,
        ),
        cost_estimate=pl.CostEstimate(
            flops=flops, transcendentals=2 * b_pad, bytes_accessed=bytes_accessed),
    )(x_gcn, adjacency, wg0, packed)

    return out[:B]


def reference_jax(x_gcn, adjacency, params):
    """Pure-JAX reference mirroring the PyTorch forward (full GCN, all columns)."""
    ax = jnp.einsum('bij,bjf->bif', adjacency, x_gcn)
    h = jnp.maximum(jnp.einsum('bif,fo->bio', ax, params['wg']) + params['bg'][None], 0.0)
    col0 = h[:, :NUM_NODES, 0]
    lat = col0.reshape(col0.shape[0], NUM_ROWS, NUM_COLS)
    v = lat.mean(axis=(1, 2))[:, None]
    feats = jnp.concatenate([v, v], axis=1)
    y = jnp.maximum(feats @ params['w1'].T + params['b1'], 0.0)
    y = y @ params['w2'].T + params['b2']
    return jax.nn.softmax(y, axis=1)


def make_params(key):
    ks = jax.random.split(key, 6)
    return {
        'wg': jax.random.normal(ks[0], (F_IN, F_OUT), jnp.float32) * 0.3,
        'bg': jax.random.normal(ks[1], (1, F_OUT), jnp.float32) * 0.1,
        'w1': jax.random.normal(ks[2], (NUM_CLASSES, NUM_CLASSES), jnp.float32) * 0.5,
        'b1': jax.random.normal(ks[3], (1, NUM_CLASSES), jnp.float32) * 0.1,
        'w2': jax.random.normal(ks[4], (NUM_CLASSES, NUM_CLASSES), jnp.float32) * 0.5,
        'b2': jax.random.normal(ks[5], (1, NUM_CLASSES), jnp.float32) * 0.1,
    }


if __name__ == "__main__":
    key = jax.random.PRNGKey(0)
    k_x, k_adj, k_p = jax.random.split(key, 3)

    B = 2
    x_gcn = jax.random.normal(k_x, (B, NUM_NODES, F_IN), jnp.float32)
    # simple dense "adjacency": sparse random edges + self loops, row-normalized
    adjacency = (jax.random.uniform(k_adj, (B, NUM_NODES, NUM_NODES), jnp.float32) < 0.1
                 ).astype(jnp.float32)
    adjacency = adjacency + jnp.eye(NUM_NODES, dtype=jnp.float32)[None]
    adjacency = adjacency / jnp.sum(adjacency, axis=-1, keepdims=True)

    params = make_params(k_p)

    out = combined_model_pool(x_gcn, adjacency, params)
    out = jax.block_until_ready(out)

    ref = reference_jax(x_gcn, adjacency, params)
    assert out.shape == (B, NUM_CLASSES)
    assert jnp.allclose(out, ref, atol=1e-5, rtol=1e-4), (out, ref)
    assert jnp.allclose(jnp.sum(out, axis=1), 1.0, atol=1e-5)

    # TODO(synk): the injected torch `gcn_model` submodule has no fixed spec;
    # it is realized here as a deterministic one-layer GCN relu(adj @ x @ Wg + bg).
    print("KERNEL_OK")
</pallas_src>

<mosaic_0001>
module attributes {stable_mosaic.version = 11 : i64} {
  func.func @combined_kernel(%arg0: i32, %arg1: memref<2x100x4xf32, #tpu.memory_space<vmem>>, %arg2: memref<2x100x100xf32, #tpu.memory_space<vmem>>, %arg3: memref<1x4xf32, #tpu.memory_space<vmem>>, %arg4: memref<13xf32, #tpu.memory_space<smem>>, %arg5: memref<2x2xf32, #tpu.memory_space<vmem>>) attributes {dimension_semantics = [#tpu.dimension_semantics<parallel>], iteration_bounds = array<i64: 1>, scalar_prefetch = 0 : i64, scratch_operands = 0 : i64, tpu.core_type = #tpu.core_type<tc>, window_params = [{transform_indices = @transform_0, window_bounds = array<i64: 2, 100, 4>}, {transform_indices = @transform_1, window_bounds = array<i64: 2, 100, 100>}, {pipeline_mode = #tpu.pipeline_mode<synchronous>, transform_indices = @transform_2, window_bounds = array<i64: 1, 4>}, {transform_indices = @transform_3, window_bounds = array<i64: 13>}, {transform_indices = @transform_4, window_bounds = array<i64: 2, 2>}]} {
    %c0 = arith.constant 0 : index
    %c0_0 = arith.constant 0 : index
    %c0_1 = arith.constant 0 : index
    %0 = vector.load %arg1[%c0, %c0_0, %c0_1] : memref<2x100x4xf32, #tpu.memory_space<vmem>>, vector<2x100x4xf32>
    %c0_2 = arith.constant 0 : index
    %c0_3 = arith.constant 0 : index
    %c0_4 = arith.constant 0 : index
    %1 = vector.load %arg2[%c0_2, %c0_3, %c0_4] : memref<2x100x100xf32, #tpu.memory_space<vmem>>, vector<2x100x100xf32>
    %c0_5 = arith.constant 0 : index
    %c0_6 = arith.constant 0 : index
    %2 = vector.load %arg3[%c0_5, %c0_6] : memref<1x4xf32, #tpu.memory_space<vmem>>, vector<1x4xf32>
    %3 = vector.shape_cast %2 : vector<1x4xf32> to vector<1x1x4xf32>
    %4 = vector.broadcast %3 : vector<1x1x4xf32> to vector<2x100x4xf32>
    %5 = arith.mulf %0, %4 : vector<2x100x4xf32>
    %cst = arith.constant dense<0.000000e+00> : vector<2x100xf32>
    %6 = vector.multi_reduction <add>, %5, %cst [2] : vector<2x100x4xf32> to vector<2x100xf32>
    %7 = vector.shape_cast %6 : vector<2x100xf32> to vector<2x1x100xf32>
    %8 = vector.broadcast %7 : vector<2x1x100xf32> to vector<2x100x100xf32>
    %9 = arith.mulf %1, %8 : vector<2x100x100xf32>
    %cst_7 = arith.constant dense<0.000000e+00> : vector<2x100xf32>
    %10 = vector.multi_reduction <add>, %9, %cst_7 [2] : vector<2x100x100xf32> to vector<2x100xf32>
    %c0_8 = arith.constant 0 : index
    %11 = memref.load %arg4[%c0_8] : memref<13xf32, #tpu.memory_space<smem>>
    %12 = vector.broadcast %11 : f32 to vector<2x100xf32>
    %13 = arith.addf %10, %12 : vector<2x100xf32>
    %cst_9 = arith.constant 0.000000e+00 : f32
    %14 = vector.broadcast %cst_9 : f32 to vector<2x100xf32>
    %15 = arith.maximumf %13, %14 : vector<2x100xf32>
    %cst_10 = arith.constant dense<0.000000e+00> : vector<2xf32>
    %16 = vector.multi_reduction <add>, %15, %cst_10 [1] : vector<2x100xf32> to vector<2xf32>
    %17 = vector.shape_cast %16 : vector<2xf32> to vector<2x1xf32>
    %cst_11 = arith.constant 1.000000e+02 : f32
    %18 = vector.broadcast %cst_11 : f32 to vector<2x1xf32>
    %19 = arith.divf %17, %18 : vector<2x1xf32>
    %c1 = arith.constant 1 : index
    %20 = memref.load %arg4[%c1] : memref<13xf32, #tpu.memory_space<smem>>
    %c2 = arith.constant 2 : index
    %21 = memref.load %arg4[%c2] : memref<13xf32, #tpu.memory_space<smem>>
    %22 = arith.addf %20, %21 : f32
    %23 = vector.broadcast %22 : f32 to vector<2x1xf32>
    %24 = arith.mulf %19, %23 : vector<2x1xf32>
    %c5 = arith.constant 5 : index
    %25 = memref.load %arg4[%c5] : memref<13xf32, #tpu.memory_space<smem>>
    %26 = vector.broadcast %25 : f32 to vector<2x1xf32>
    %27 = arith.addf %24, %26 : vector<2x1xf32>
    %cst_12 = arith.constant 0.000000e+00 : f32
    %28 = vector.broadcast %cst_12 : f32 to vector<2x1xf32>
    %29 = arith.maximumf %27, %28 : vector<2x1xf32>
    %c3 = arith.constant 3 : index
    %30 = memref.load %arg4[%c3] : memref<13xf32, #tpu.memory_space<smem>>
    %c4 = arith.constant 4 : index
    %31 = memref.load %arg4[%c4] : memref<13xf32, #tpu.memory_space<smem>>
    %32 = arith.addf %30, %31 : f32
    %33 = vector.broadcast %32 : f32 to vector<2x1xf32>
    %34 = arith.mulf %19, %33 : vector<2x1xf32>
    %c6 = arith.constant 6 : index
    %35 = memref.load %arg4[%c6] : memref<13xf32, #tpu.memory_space<smem>>
    %36 = vector.broadcast %35 : f32 to vector<2x1xf32>
    %37 = arith.addf %34, %36 : vector<2x1xf32>
    %cst_13 = arith.constant 0.000000e+00 : f32
    %38 = vector.broadcast %cst_13 : f32 to vector<2x1xf32>
    %39 = arith.maximumf %37, %38 : vector<2x1xf32>
    %c7 = arith.constant 7 : index
    %40 = memref.load %arg4[%c7] : memref<13xf32, #tpu.memory_space<smem>>
    %41 = vector.broadcast %40 : f32 to vector<2x1xf32>
    %42 = arith.mulf %29, %41 : vector<2x1xf32>
    %c8 = arith.constant 8 : index
    %43 = memref.load %arg4[%c8] : memref<13xf32, #tpu.memory_space<smem>>
    %44 = vector.broadcast %43 : f32 to vector<2x1xf32>
    %45 = arith.mulf %39, %44 : vector<2x1xf32>
    %46 = arith.addf %42, %45 : vector<2x1xf32>
    %c11 = arith.constant 11 : index
    %47 = memref.load %arg4[%c11] : memref<13xf32, #tpu.memory_space<smem>>
    %48 = vector.broadcast %47 : f32 to vector<2x1xf32>
    %49 = arith.addf %46, %48 : vector<2x1xf32>
    %c9 = arith.constant 9 : index
    %50 = memref.load %arg4[%c9] : memref<13xf32, #tpu.memory_space<smem>>
    %51 = vector.broadcast %50 : f32 to vector<2x1xf32>
    %52 = arith.mulf %29, %51 : vector<2x1xf32>
    %c10 = arith.constant 10 : index
    %53 = memref.load %arg4[%c10] : memref<13xf32, #tpu.memory_space<smem>>
    %54 = vector.broadcast %53 : f32 to vector<2x1xf32>
    %55 = arith.mulf %39, %54 : vector<2x1xf32>
    %56 = arith.addf %52, %55 : vector<2x1xf32>
    %c12 = arith.constant 12 : index
    %57 = memref.load %arg4[%c12] : memref<13xf32, #tpu.memory_space<smem>>
    %58 = vector.broadcast %57 : f32 to vector<2x1xf32>
    %59 = arith.addf %56, %58 : vector<2x1xf32>
    %60 = arith.maximumf %49, %59 : vector<2x1xf32>
    %61 = arith.subf %49, %60 : vector<2x1xf32>
    %62 = math.exp %61 : vector<2x1xf32>
    %63 = arith.subf %59, %60 : vector<2x1xf32>
    %64 = math.exp %63 : vector<2x1xf32>
    %65 = arith.addf %62, %64 : vector<2x1xf32>
    %cst_14 = arith.constant 1.000000e+00 : f32
    %66 = vector.broadcast %cst_14 : f32 to vector<2x1xf32>
    %67 = arith.divf %66, %65 : vector<2x1xf32>
    %68 = arith.mulf %62, %67 : vector<2x1xf32>
    %69 = arith.mulf %64, %67 : vector<2x1xf32>
    %70 = tpu.concatenate %68, %69 in 1 : vector<2x1xf32>, vector<2x1xf32> -> vector<2x2xf32>
    %c0_15 = arith.constant 0 : index
    %c0_16 = arith.constant 0 : index
    %71 = vector.load %arg5[%c0_15, %c0_16] : memref<2x2xf32, #tpu.memory_space<vmem>>, vector<2x2xf32>
    tpu.vector_store %arg5[%c0_15, %c0_16], %70 {strides = array<i32>} : memref<2x2xf32, #tpu.memory_space<vmem>>, vector<2x2xf32>,
    return
  }
  func.func @transform_0(%arg0: i32) -> (i32, i32, i32) {
    %c0_i32 = arith.constant 0 : i32
    %c0_i32_0 = arith.constant 0 : i32
    %c0_i32_1 = arith.constant 0 : i32
    return %arg0, %c0_i32, %c0_i32_0 : i32, i32, i32
  }
  func.func @transform_1(%arg0: i32) -> (i32, i32, i32) {
    %c0_i32 = arith.constant 0 : i32
    %c0_i32_0 = arith.constant 0 : i32
    %c0_i32_1 = arith.constant 0 : i32
    return %arg0, %c0_i32, %c0_i32_0 : i32, i32, i32
  }
  func.func @transform_2(%arg0: i32) -> (i32, i32) {
    %c0_i32 = arith.constant 0 : i32
    %c0_i32_0 = arith.constant 0 : i32
    %c0_i32_1 = arith.constant 0 : i32
    return %c0_i32, %c0_i32_0 : i32, i32
  }
  func.func @transform_3(%arg0: i32) -> i32 {
    %c0_i32 = arith.constant 0 : i32
    %c0_i32_0 = arith.constant 0 : i32
    return %c0_i32 : i32
  }
  func.func @transform_4(%arg0: i32) -> (i32, i32) {
    %c0_i32 = arith.constant 0 : i32
    %c0_i32_0 = arith.constant 0 : i32
    return %arg0, %c0_i32 : i32, i32
  }
}

</mosaic_0001>

<bundles_post_ra>
// kernel: tpu_custom_call.1
= control target key start
LH: loop header
LB: loop body
LE: loop exit
PB: predicated region body
PF: predicated region fallthrough
CT: control target
= control target key end

     0   :  { %9 = vsyncpa [#allocation4], 0  ;;  %s1353_s0 = inlined_call_operand.vmem [shape: f32[2,100,4], index: 0, kind: input, shape index: {}]   ;;  %s1354_s1 = inlined_call_operand.vmem [shape: f32[2,100,100], index: 1, kind: input, shape index: {}]   ;;  %s1355_s2 = inlined_call_operand.vmem [shape: f32[1,4], index: 2, kind: input, shape index: {}]   ;;  %s1356_s3 = inlined_call_operand.vmem [shape: f32[13], index: 3, kind: input, shape index: {}]   ;;  %s1357_s4 = inlined_call_operand.hbm [shape: f32[2,2], index: 4, kind: output, shape index: {}]  }
   0x1   :  { %10 = vsyncpa [#allocation3], 0  ;;  %s23_s17 = sshll.u32 %s1356_s3, 4  ;;  %s24_s17 = int_to_ptr.vmem [resolvable:$true] %s23_s17 }
   0x2   :  { %s811_s18 = scalar_lea.vmem %s24_s17, 16  ;;  %p816_p1 = scmp.lt.s32.totalorder %s24_s17, %s24_s17 }
   0x3   :  { %p812_p0 = scmp.ne.s32.totalorder %s24_s17, %s811_s18  ;;  %p817_p2 = scmp.lt.s32.totalorder %s811_s18, %s811_s18 }
   0x5   :  { %p818_p3 = por %p817_p2, %p816_p1 }
   0x7   :  { %p819_p4 = pnand %p818_p3, %p812_p0 }
   0x9   :  { %822 = shalt.err (!%p819_p4)
}
   0xa   :  { %s847_s19 = smov [#allocation2]  }
   0xb   :  { %26 = dma.vmem_to_smem %s24_s17, 16, %s847_s19, [#allocation4]  }
   0xc   :  { %843 = dma.done.wait [#allocation4], 16  }
   0xd   :  { %844 = vsyncadd [#allocation4], 4294967280 }
   0xe   :  { %30 = sfence }
   0xf   :  { %v44_v0 = vld [vmem:[%s1353_s0 + $0x68] sm:$0xff]  ;;  %v883_v1 = vld [vmem:[%s1355_s2] ss:$0 sm:$0xff]  ;;  %vm116_vm0 = vcmask 31744   ;;  %v45_v5 = vld [vmem:[%s1353_s0 + $0x70] sm:$0xff]  ;;  %vm153_vm1 = vcmask 27648  }
  0x10   :  { %v31_v2 = vld [vmem:[%s1353_s0] sm:$0xff]  ;;  %v103_v3 = vmul.f32 %v883_v1, %v44_v0  ;;  %v32_v6 = vld [vmem:[%s1353_s0 + $0x8] sm:$0xff]  ;;  %v104_v7 = vmul.f32 %v883_v1, %v45_v5  ;;  %v46_v9 = vld [vmem:[%s1353_s0 + $0x78] sm:$0xff]  ;;  %vm233_vm2 = vcmask 130112   ;;  %vm240_vm3 = vcmask 195712   ;;  %s791_s12 = sld [smem:[#allocation2 + $0x1]] }
  0x11   :  { %v90_v4 = vmul.f32 %v883_v1, %v31_v2  ;;  %v91_v8 = vmul.f32 %v883_v1, %v32_v6  ;;  %v33_v10 = vld [vmem:[%s1353_s0 + $0x10] sm:$0xff]  ;;  %v105_v15 = vmul.f32 %v883_v1, %v46_v9  ;;  %v47_v17 = vld [vmem:[%s1353_s0 + $0x80] sm:$0xff]  ;;  %v34_v18 = vld [vmem:[%s1353_s0 + $0x18] sm:$0xff]  ;;  %vm247_vm4 = vcmask 261312   ;;  %s792_s13 = sld [smem:[#allocation2 + $0x2]]  ;;  %s848_s24 = smov [#allocation5]  }
  0x12   :  { %v157_v11 = vsel %vm116_vm0, %v103_v3, 0.0  ;;  %v160_v13 = vsel %vm116_vm0, %v104_v7, 0.0  ;;  %v92_v16 = vmul.f32 %v883_v1, %v33_v10  ;;  %v106_v21 = vmul.f32 %v883_v1, %v47_v17  ;;  %v48_v23 = vld [vmem:[%s1353_s0 + $0x88] sm:$0xff]  ;;  %v35_v24 = vld [vmem:[%s1353_s0 + $0x20] sm:$0xff]  ;;  %v49_v29 = vld [vmem:[%s1353_s0 + $0x90] sm:$0xff]  ;;  %s794_s14 = sld [smem:[#allocation2 + $0x3]] }
  0x13   :  { %v117_v12 = vsel %vm116_vm0, %v90_v4, 0.0  ;;  %158 = vadd.xlane.f32.xlu1 %v157_v11  ;;  %v120_v14 = vsel %vm116_vm0, %v91_v8, 0.0  ;;  %v163_v19 = vsel %vm116_vm0, %v105_v15, 0.0  ;;  %v93_v22 = vmul.f32 %v883_v1, %v34_v18  ;;  %v36_v30 = vld [vmem:[%s1353_s0 + $0x28] sm:$0xff]  ;;  %v50_v35 = vld [vmem:[%s1353_s0 + $0x98] sm:$0xff]  ;;  %v37_v36 = vld [vmem:[%s1353_s0 + $0x30] sm:$0xff] }
  0x14   :  { %118 = vadd.xlane.f32.xlu0 %v117_v12  ;;  %v123_v20 = vsel %vm116_vm0, %v92_v16, 0.0  ;;  %v166_v25 = vsel %vm116_vm0, %v106_v21, 0.0  ;;  %v107_v27 = vmul.f32 %v883_v1, %v48_v23  ;;  %v94_v28 = vmul.f32 %v883_v1, %v35_v24  ;;  %v51_v41 = vld [vmem:[%s1353_s0 + $0xa0] sm:$0xff]  ;;  %v38_v42 = vld [vmem:[%s1353_s0 + $0x38] sm:$0xff]  ;;  %v52_v47 = vld [vmem:[%s1353_s0 + $0xa8] sm:$0xff]  ;;  %s795_s15 = sld [smem:[#allocation2 + $0x4]] }
  0x15   :  { %v126_v26 = vsel %vm116_vm0, %v93_v22, 0.0  ;;  %v108_v33 = vmul.f32 %v883_v1, %v49_v29  ;;  %v95_v34 = vmul.f32 %v883_v1, %v36_v30  ;;  %v109_v39 = vmul.f32 %v883_v1, %v50_v35  ;;  %v39_v48 = vld [vmem:[%s1353_s0 + $0x40] sm:$0xff]  ;;  %v53_v53 = vld [vmem:[%s1353_s0 + $0xb0] sm:$0xff]  ;;  %v40_v54 = vld [vmem:[%s1353_s0 + $0x48] sm:$0xff]  ;;  %s793_s16 = sld [smem:[#allocation2 + $0x5]]  ;;  %s781_s25 = sshll.u32 %s848_s24, 4  ;;  %s782_s25 = int_to_ptr.vmem [resolvable:$true] %s781_s25 }
  0x16   :  { %v169_v31 = vsel %vm116_vm0, %v107_v27, 0.0  ;;  %v129_v32 = vsel %vm116_vm0, %v94_v28, 0.0  ;;  %v96_v40 = vmul.f32 %v883_v1, %v37_v36  ;;  %v110_v45 = vmul.f32 %v883_v1, %v51_v41  ;;  %v54_v59 = vld [vmem:[%s1353_s0 + $0xb8] sm:$0xff]  ;;  %v41_v60 = vld [vmem:[%s1353_s0 + $0x50] sm:$0xff]  ;;  %v55_v2 = vld [vmem:[%s1353_s0 + $0xc0] sm:$0xff]  ;;  %s796_s17 = sld [smem:[#allocation2 + $0x6]]  ;;  %p828_p6 = scmp.lt.s32.totalorder %s782_s25, %s782_s25 }
  0x17   :  { %161 = vadd.xlane.f32.xlu1 %v160_v13  ;;  %v172_v37 = vsel %vm116_vm0, %v108_v33, 0.0  ;;  %v132_v38 = vsel %vm116_vm0, %v95_v34, 0.0  ;;  %v175_v43 = vsel %vm116_vm0, %v109_v39, 0.0  ;;  %v97_v46 = vmul.f32 %v883_v1, %v38_v42  ;;  %v42_v3 = vld [vmem:[%s1353_s0 + $0x58] sm:$0xff]  ;;  %v56_v8 = vld [vmem:[%s1353_s0 + $0xc8] sm:$0xf]  ;;  %s723_s18 = sadd.f32 %s792_s13, %s791_s12 }
  0x18   :  { %121 = vadd.xlane.f32.xlu0 %v120_v14  ;;  %v135_v44 = vsel %vm116_vm0, %v96_v40, 0.0  ;;  %v178_v49 = vsel %vm116_vm0, %v110_v45, 0.0  ;;  %v111_v51 = vmul.f32 %v883_v1, %v52_v47  ;;  %v98_v52 = vmul.f32 %v883_v1, %v39_v48  ;;  %v43_v9 = vld [vmem:[%s1353_s0 + $0x60] sm:$0xf]  ;;  %s797_s0 = sld [smem:[#allocation2 + $0x7]]  ;;  %s823_s26 = scalar_lea.vmem %s782_s25, 32 }
  0x19   :  { %v138_v50 = vsel %vm116_vm0, %v97_v46, 0.0  ;;  %v112_v57 = vmul.f32 %v883_v1, %v53_v53  ;;  %v99_v58 = vmul.f32 %v883_v1, %v40_v54  ;;  %v113_v63 = vmul.f32 %v883_v1, %v54_v59  ;;  %s798_s19 = sld [smem:[#allocation2 + $0x8]]  ;;  %p824_p5 = scmp.ne.s32.totalorder %s782_s25, %s823_s26 }
  0x1a   :  { %v181_v55 = vsel %vm116_vm0, %v111_v51, 0.0  ;;  %v141_v56 = vsel %vm116_vm0, %v98_v52, 0.0  ;;  %v100_v0 = vmul.f32 %v883_v1, %v41_v60  ;;  %v114_v6 = vmul.f32 %v883_v1, %v55_v2  ;;  %s732_s20 = sadd.f32 %s795_s15, %s794_s14  ;;  %p829_p7 = scmp.lt.s32.totalorder %s823_s26, %s823_s26 }
  0x1b   :  { %164 = vadd.xlane.f32.xlu1 %v163_v19  ;;  %v184_v61 = vsel %vm116_vm0, %v112_v57, 0.0  ;;  %v144_v62 = vsel %vm116_vm0, %v99_v58, 0.0  ;;  %v187_v4 = vsel %vm116_vm0, %v113_v63, 0.0  ;;  %v101_v7 = vmul.f32 %v883_v1, %v42_v3  ;;  %s800_s21 = sld [smem:[#allocation2 + $0x9]] }
  0x1c   :  { %124 = vadd.xlane.f32.xlu0 %v123_v20  ;;  %v147_v5 = vsel %vm116_vm0, %v100_v0, 0.0  ;;  %v190_v10 = vsel %vm116_vm0, %v114_v6, 0.0  ;;  %v115_v12 = vmul.f32 %v883_v1, %v56_v8  ;;  %v102_v13 = vmul.f32 %v883_v1, %v43_v9  ;;  %s801_s22 = sld [smem:[#allocation2 + $0xa]]  ;;  %p830_p8 = por %p829_p7, %p828_p6 }
  0x1d   :  { %v150_v11 = vsel %vm116_vm0, %v101_v7, 0.0  ;;  %v222_v27 = vlaneseq  ;;  %vm254_vm5 = vcmask 326912   ;;  %vm261_vm6 = vcmask 392512   ;;  %s799_s23 = sld [smem:[#allocation2 + $0xb]] }
  0x1e   :  { %v193_v14 = vsel %vm153_vm1, %v115_v12, 0.0  ;;  %v154_v15 = vsel %vm153_vm1, %v102_v13, 0.0  ;;  %vm268_vm7 = vcmask 458112   ;;  %vm275_vm8 = vcmask 523712   ;;  %s802_s3 = sld [smem:[#allocation2 + $0xc]]  ;;  %p831_p9 = pnand %p830_p8, %p824_p5 }
  0x1f   :  { %167 = vadd.xlane.f32.xlu1 %v166_v25  ;;  %v223_v30 = vand.u32 127, %v222_v27  ;;  %vm282_vm9 = vcmask 589312   ;;  %vm289_vm10 = vcmask 654912   ;;  %vm296_vm11 = vcmask 720512  }
  0x20   :  { %127 = vadd.xlane.f32.xlu0 %v126_v26  ;;  %vm303_vm12 = vcmask 786112   ;;  %vm310_vm13 = vcmask 851712   ;;  %vm425_vm14 = vcmask 818176   ;;  %vm462_vm15 = vcmask 814080  }
  0x21   :  { %v235_v33 = vadd.s32 4294967280, %v223_v30  ;;  %v242_v34 = vadd.s32 4294967272, %v223_v30  ;;  %v263_v39 = vadd.s32 4294967248, %v223_v30  ;;  %v270_v40 = vadd.s32 4294967240, %v223_v30 }
  0x22   :  { %v284_v48 = vadd.s32 4294967224, %v223_v30  ;;  %v291_v51 = vadd.s32 4294967216, %v223_v30  ;;  %vm376_vm0 = vcmask 1041409   ;;  %vm715_vm1 = vcmask 812032  }
  0x23   :  { %170 = vadd.xlane.f32.xlu1 %v169_v31  ;;  %v225_v31 = vshrl.u32 %v222_v27, 7 }
  0x24   :  { %130 = vadd.xlane.f32.xlu0 %v129_v32  ;;  %v228_v32 = vadd.s32 4294967288, %v223_v30 }
  0x25   :  { %v1042_v41 = vsub.s32 %v223_v30, %v225_v31  ;;  %v1048_v45 = vsub.s32 %v242_v34, %v225_v31  ;;  %v1058_v52 = vsub.s32 %v263_v39, %v225_v31  ;;  %v1060_v53 = vsub.s32 %v270_v40, %v225_v31 }
  0x26   :  { %v1044_v42 = vsub.s32 %v228_v32, %v225_v31  ;;  %v1070_v60 = vsub.s32 %v284_v48, %v225_v31  ;;  %v1076_v2 = vsub.s32 %v291_v51, %v225_v31 }
  0x27   :  { %173 = vadd.xlane.f32.xlu1 %v172_v37  ;;  %v249_v37 = vadd.s32 4294967264, %v223_v30 }
  0x28   :  { %133 = vadd.xlane.f32.xlu0 %v132_v38  ;;  %v256_v38 = vadd.s32 4294967256, %v223_v30 }
  0x2b   :  { %176 = vadd.xlane.f32.xlu1 %v175_v43  ;;  %v1046_v43 = vsub.s32 %v235_v33, %v225_v31 }
  0x2c   :  { %136 = vadd.xlane.f32.xlu0 %v135_v44  ;;  %v277_v44 = vadd.s32 4294967232, %v223_v30 }
  0x2e   :  { %v1062_v54 = vsub.s32 %v277_v44, %v225_v31 }
  0x2f   :  { %179 = vadd.xlane.f32.xlu1 %v178_v49  ;;  %v1054_v49 = vsub.s32 %v249_v37, %v225_v31 }
  0x30   :  { %139 = vadd.xlane.f32.xlu0 %v138_v50  ;;  %v1056_v50 = vsub.s32 %v256_v38, %v225_v31 }
  0x33   :  { %182 = vadd.xlane.f32.xlu1 %v181_v55  ;;  %v298_v55 = vadd.s32 4294967208, %v223_v30 }
  0x34   :  { %142 = vadd.xlane.f32.xlu0 %v141_v56  ;;  %v305_v56 = vadd.s32 4294967200, %v223_v30 }
  0x35   :  { %v1088_v8 = vsub.s32 %v298_v55, %v225_v31 }
  0x36   :  { %v1090_v9 = vsub.s32 %v305_v56, %v225_v31 }
  0x37   :  { %185 = vadd.xlane.f32.xlu1 %v184_v61 }
  0x38   :  { %145 = vadd.xlane.f32.xlu0 %v144_v62 }
  0x3b   :  { %188 = vadd.xlane.f32.xlu1 %v187_v4 }
  0x3c   :  { %148 = vadd.xlane.f32.xlu0 %v147_v5 }
  0x3f   :  { %191 = vadd.xlane.f32.xlu1 %v190_v10 }
  0x40   :  { %151 = vadd.xlane.f32.xlu0 %v150_v11 }
  0x43   :  { %194 = vadd.xlane.f32.xlu1 %v193_v14 }
  0x44   :  { %155 = vadd.xlane.f32.xlu0 %v154_v15 }
  0x9c   :  { %v1010_v16 = vpop.xlane.xlu1 %158 }
  0x9d   :  { %v1012_v17 = vpop.xlane.xlu0 %118  ;;  %v315_v57 = vrot.slane %v1010_v16, %v1042_v41 }
  0x9e   :  { %v227_v3 = vrot.slane %v1012_v17, %v1042_v41 }
  0xa0   :  { %v1014_v18 = vpop.xlane.xlu1 %161 }
  0xa1   :  { %v1016_v19 = vpop.xlane.xlu0 %121  ;;  %v319_v58 = vrot.slane %v1014_v18, %v1044_v42 }
  0xa2   :  { %v232_v59 = vrot.slane %v1016_v19, %v1044_v42 }
  0xa3   :  { %v320_v10 = vsel %vm233_vm2, %v319_v58, %v315_v57 }
  0xa4   :  { %v1018_v20 = vpop.xlane.xlu1 %164  ;;  %v234_v11 = vsel %vm233_vm2, %v232_v59, %v227_v3 }
  0xa5   :  { %v1020_v21 = vpop.xlane.xlu0 %124  ;;  %v324_v63 = vrot.slane %v1018_v20, %v1046_v43 }
  0xa6   :  { %v239_v0 = vrot.slane %v1020_v21, %v1046_v43 }
  0xa7   :  { %v325_v16 = vsel %vm240_vm3, %v324_v63, %v320_v10 }
  0xa8   :  { %v1022_v1 = vpop.xlane.xlu1 %167  ;;  %v241_v17 = vsel %vm240_vm3, %v239_v0, %v234_v11 }
  0xa9   :  { %v1024_v22 = vpop.xlane.xlu0 %127  ;;  %v329_v4 = vrot.slane %v1022_v1, %v1048_v45 }
  0xaa   :  { %v246_v5 = vrot.slane %v1024_v22, %v1048_v45 }
  0xab   :  { %v330_v20 = vsel %vm247_vm4, %v329_v4, %v325_v16  ;;  %v59_v16 = vld [vmem:[%s1354_s1 + $0x10] sm:$0xff] }
  0xac   :  { %v1026_v23 = vpop.xlane.xlu1 %170  ;;  %v248_v21 = vsel %vm247_vm4, %v246_v5, %v241_v17  ;;  %v71_v5 = vld [vmem:[%s1354_s1 + $0x70] sm:$0xff] }
  0xad   :  { %v1028_v24 = vpop.xlane.xlu0 %130  ;;  %v334_v6 = vrot.slane %v1026_v23, %v1054_v49 }
  0xae   :  { %v253_v7 = vrot.slane %v1028_v24, %v1054_v49 }
  0xaf   :  { %v335_v23 = vsel %vm254_vm5, %v334_v6, %v330_v20  ;;  %v70_v6 = vld [vmem:[%s1354_s1 + $0x68] sm:$0xff] }
  0xb0   :  { %v1030_v25 = vpop.xlane.xlu1 %173  ;;  %v255_v24 = vsel %vm254_vm5, %v253_v7, %v248_v21  ;;  %v73_v21 = vld [vmem:[%s1354_s1 + $0x80] sm:$0xff] }
  0xb1   :  { %v1032_v26 = vpop.xlane.xlu0 %133  ;;  %v339_v12 = vrot.slane %v1030_v25, %v1056_v50 }
  0xb2   :  { %v260_v13 = vrot.slane %v1032_v26, %v1056_v50 }
  0xb3   :  { %v340_v27 = vsel %vm261_vm6, %v339_v12, %v335_v23 }
  0xb4   :  { %v1034_v28 = vpop.xlane.xlu1 %176 }
  0xb5   :  { %v1036_v29 = vpop.xlane.xlu0 %136  ;;  %v344_v18 = vrot.slane %v1034_v28, %v1058_v52  ;;  %v262_v28 = vsel %vm261_vm6, %v260_v13, %v255_v24 }
  0xb6   :  { %v267_v19 = vrot.slane %v1036_v29, %v1058_v52 }
  0xb7   :  { %v345_v33 = vsel %vm268_vm7, %v344_v18, %v340_v27  ;;  %v61_v27 = vld [vmem:[%s1354_s1 + $0x20] sm:$0xff] }
  0xb8   :  { %v1038_v35 = vpop.xlane.xlu1 %179  ;;  %v269_v34 = vsel %vm268_vm7, %v267_v19, %v262_v28 }
  0xb9   :  { %v1040_v36 = vpop.xlane.xlu0 %139  ;;  %v349_v1 = vrot.slane %v1038_v35, %v1060_v53 }
  0xba   :  { %v274_v22 = vrot.slane %v1040_v36, %v1060_v53 }
  0xbb   :  { %v350_v37 = vsel %vm275_vm8, %v349_v1, %v345_v33  ;;  %v60_v1 = vld [vmem:[%s1354_s1 + $0x18] sm:$0xff]  ;;  %v62_v33 = vld [vmem:[%s1354_s1 + $0x28] sm:$0xff] }
  0xbc   :  { %v1050_v46 = vpop.xlane.xlu1 %182  ;;  %v276_v38 = vsel %vm275_vm8, %v274_v22, %v269_v34 }
  0xbd   :  { %v1052_v47 = vpop.xlane.xlu0 %142  ;;  %v354_v25 = vrot.slane %v1050_v46, %v1062_v54 }
  0xbe   :  { %v281_v26 = vrot.slane %v1052_v47, %v1062_v54 }
  0xbf   :  { %v355_v44 = vsel %vm282_vm9, %v354_v25, %v350_v37 }
  0xc0   :  { %v186_v61 = vpop.xlane.xlu1 %185  ;;  %v283_v46 = vsel %vm282_vm9, %v281_v26, %v276_v38  ;;  %v74_v26 = vld [vmem:[%s1354_s1 + $0x88] sm:$0xff]  ;;  %v76_v38 = vld [vmem:[%s1354_s1 + $0x98] sm:$0xff] }
  0xc1   :  { %v146_v62 = vpop.xlane.xlu0 %145  ;;  %v359_v29 = vrot.slane %v186_v61, %v1070_v60  ;;  %v58_v61 = vld [vmem:[%s1354_s1 + $0x8] sm:$0xff] }
  0xc2   :  { %v288_v30 = vrot.slane %v146_v62, %v1070_v60  ;;  %v57_v62 = vld [vmem:[%s1354_s1] sm:$0xff] }
  0xc3   :  { %v360_v47 = vsel %vm289_vm10, %v359_v29, %v355_v44 }
  0xc4   :  { %v189_v14 = vpop.xlane.xlu1 %188  ;;  %v290_v48 = vsel %vm289_vm10, %v288_v30, %v283_v46 }
  0xc5   :  { %v149_v15 = vpop.xlane.xlu0 %148  ;;  %v364_v35 = vrot.slane %v189_v14, %v1076_v2 }
  0xc6   :  { %v295_v36 = vrot.slane %v149_v15, %v1076_v2  ;;  %v72_v15 = vld [vmem:[%s1354_s1 + $0x78] sm:$0xff] }
  0xc7   :  { %v365_v56 = vsel %vm296_vm11, %v364_v35, %v360_v47 }
  0xc8   :  { %v192_v31 = vpop.xlane.xlu1 %191  ;;  %v297_v57 = vsel %vm296_vm11, %v295_v36, %v290_v48  ;;  %v77_v48 = vld [vmem:[%s1354_s1 + $0xa0] sm:$0xff] }
  0xc9   :  { %v152_v32 = vpop.xlane.xlu0 %151  ;;  %v369_v39 = vrot.slane %v192_v31, %v1088_v8 }
  0xca   :  { %v302_v40 = vrot.slane %v152_v32, %v1088_v8  ;;  %v75_v32 = vld [vmem:[%s1354_s1 + $0x90] sm:$0xff] }
  0xcb   :  { %v370_v63 = vsel %vm303_vm12, %v369_v39, %v365_v56  ;;  %v63_v39 = vld [vmem:[%s1354_s1 + $0x30] sm:$0xff] }
  0xcc   :  { %v195_v51 = vpop.xlane.xlu1 %194  ;;  %v304_v0 = vsel %vm303_vm12, %v302_v40, %v297_v57 }
  0xcd   :  { %v156_v55 = vpop.xlane.xlu0 %155  ;;  %v374_v58 = vrot.slane %v195_v51, %v1090_v9  ;;  %v64_v51 = vld [vmem:[%s1354_s1 + $0x38] sm:$0xff] }
  0xce   :  { %v309_v59 = vrot.slane %v156_v55, %v1090_v9 }
  0xcf   :  { %v1145_v3 = vsel %vm310_vm13, %v374_v58, %v370_v63 }
  0xd0   :  { %v1148_v4 = vsel %vm310_vm13, %v309_v59, %v304_v0  ;;  %v413_v13 = vmul.f32 %v1145_v3, %v71_v5  ;;  %v412_v14 = vmul.f32 %v1145_v3, %v70_v6  ;;  %v414_v19 = vmul.f32 %v1145_v3, %v72_v15  ;;  %v78_v59 = vld [vmem:[%s1354_s1 + $0xa8] sm:$0xff]  ;;  %v79_v6 = vld [vmem:[%s1354_s1 + $0xb0] sm:$0xff] }
  0xd1   :  { %v400_v7 = vmul.f32 %v1148_v4, %v58_v61  ;;  %v399_v10 = vmul.f32 %v1148_v4, %v57_v62  ;;  %v401_v20 = vmul.f32 %v1148_v4, %v59_v16  ;;  %v415_v24 = vmul.f32 %v1145_v3, %v73_v21  ;;  %v65_v61 = vld [vmem:[%s1354_s1 + $0x40] sm:$0xff]  ;;  %v67_v15 = vld [vmem:[%s1354_s1 + $0x50] sm:$0xff]  ;;  %v68_v21 = vld [vmem:[%s1354_s1 + $0x58] sm:$0xff] }
  0xd2   :  { %v469_v17 = vsel %vm425_vm14, %v413_v13, 0.0  ;;  %v466_v18 = vsel %vm425_vm14, %v412_v14, 0.0  ;;  %v472_v22 = vsel %vm425_vm14, %v414_v19, 0.0  ;;  %v402_v25 = vmul.f32 %v1148_v4, %v60_v1  ;;  %v80_v14 = vld [vmem:[%s1354_s1 + $0xb8] sm:$0xff] }
  0xd3   :  { %v429_v11 = vsel %vm425_vm14, %v400_v7, 0.0  ;;  %v426_v12 = vsel %vm425_vm14, %v399_v10, 0.0  ;;  %v432_v23 = vsel %vm425_vm14, %v401_v20, 0.0  ;;  %v475_v28 = vsel %vm425_vm14, %v415_v24, 0.0  ;;  %v66_v7 = vld [vmem:[%s1354_s1 + $0x48] sm:$0xff]  ;;  %v81_v20 = vld [vmem:[%s1354_s1 + $0xc0] sm:$0xff] }
  0xd4   :  { %430 = vadd.xlane.f32.xlu1 %v429_v11  ;;  %427 = vadd.xlane.f32.xlu0 %v426_v12  ;;  %v435_v29 = vsel %vm425_vm14, %v402_v25, 0.0  ;;  %v416_v30 = vmul.f32 %v1145_v3, %v74_v26  ;;  %v403_v31 = vmul.f32 %v1148_v4, %v61_v27  ;;  %v417_v36 = vmul.f32 %v1145_v3, %v75_v32  ;;  %v82_v25 = vld [vmem:[%s1354_s1 + $0xc8] sm:$0xf]  ;;  %v69_v26 = vld [vmem:[%s1354_s1 + $0x60] sm:$0xf]  ;;  %s505_s1 = sld [smem:[#allocation2]] }
  0xd5   :  { %v404_v37 = vmul.f32 %v1148_v4, %v62_v33  ;;  %v418_v46 = vmul.f32 %v1145_v3, %v76_v38  ;;  %v405_v47 = vmul.f32 %v1148_v4, %v63_v39  ;;  %v419_v57 = vmul.f32 %v1145_v3, %v77_v48 }
  0xd6   :  { %v478_v34 = vsel %vm425_vm14, %v416_v30, 0.0  ;;  %v438_v35 = vsel %vm425_vm14, %v403_v31, 0.0  ;;  %v481_v40 = vsel %vm425_vm14, %v417_v36, 0.0  ;;  %v406_v58 = vmul.f32 %v1148_v4, %v64_v51 }
  0xd7   :  { %v441_v44 = vsel %vm425_vm14, %v404_v37, 0.0  ;;  %v484_v55 = vsel %vm425_vm14, %v418_v46, 0.0  ;;  %v444_v56 = vsel %vm425_vm14, %v405_v47, 0.0  ;;  %v487_v62 = vsel %vm425_vm14, %v419_v57, 0.0 }
  0xd8   :  { %470 = vadd.xlane.f32.xlu1 %v469_v17  ;;  %467 = vadd.xlane.f32.xlu0 %v466_v18  ;;  %v447_v63 = vsel %vm425_vm14, %v406_v58, 0.0  ;;  %v420_v0 = vmul.f32 %v1145_v3, %v78_v59  ;;  %v407_v5 = vmul.f32 %v1148_v4, %v65_v61  ;;  %v421_v12 = vmul.f32 %v1145_v3, %v79_v6 }
  0xd9   :  { %v408_v13 = vmul.f32 %v1148_v4, %v66_v7  ;;  %v422_v18 = vmul.f32 %v1145_v3, %v80_v14  ;;  %v409_v19 = vmul.f32 %v1148_v4, %v67_v15  ;;  %v410_v24 = vmul.f32 %v1148_v4, %v68_v21 }
  0xda   :  { %v490_v10 = vsel %vm425_vm14, %v420_v0, 0.0  ;;  %v450_v11 = vsel %vm425_vm14, %v407_v5, 0.0  ;;  %v493_v16 = vsel %vm425_vm14, %v421_v12, 0.0  ;;  %v411_v30 = vmul.f32 %v1148_v4, %v69_v26 }
  0xdb   :  { %v453_v17 = vsel %vm425_vm14, %v408_v13, 0.0  ;;  %v496_v1 = vsel %vm425_vm14, %v422_v18, 0.0  ;;  %v1272_v47 = vstv %s505_s1 }
  0xdc   :  { %473 = vadd.xlane.f32.xlu1 %v472_v22  ;;  %433 = vadd.xlane.f32.xlu0 %v432_v23  ;;  %v456_v22 = vsel %vm425_vm14, %v409_v19, 0.0  ;;  %v423_v23 = vmul.f32 %v1145_v3, %v81_v20  ;;  %v463_v32 = vsel %vm462_vm15, %v411_v30, 0.0 }
  0xde   :  { %v499_v27 = vsel %vm425_vm14, %v423_v23, 0.0 }
  0xe0   :  { %476 = vadd.xlane.f32.xlu1 %v475_v28  ;;  %436 = vadd.xlane.f32.xlu0 %v435_v29  ;;  %v459_v28 = vsel %vm425_vm14, %v410_v24, 0.0  ;;  %v424_v29 = vmul.f32 %v1145_v3, %v82_v25 }
  0xe2   :  { %v502_v31 = vsel %vm462_vm15, %v424_v29, 0.0 }
  0xe4   :  { %479 = vadd.xlane.f32.xlu1 %v478_v34  ;;  %439 = vadd.xlane.f32.xlu0 %v438_v35 }
  0xe8   :  { %482 = vadd.xlane.f32.xlu1 %v481_v40  ;;  %442 = vadd.xlane.f32.xlu0 %v441_v44 }
  0xec   :  { %485 = vadd.xlane.f32.xlu1 %v484_v55  ;;  %445 = vadd.xlane.f32.xlu0 %v444_v56 }
  0xf0   :  { %488 = vadd.xlane.f32.xlu1 %v487_v62  ;;  %448 = vadd.xlane.f32.xlu0 %v447_v63 }
  0xf4   :  { %491 = vadd.xlane.f32.xlu1 %v490_v10  ;;  %451 = vadd.xlane.f32.xlu0 %v450_v11 }
  0xf8   :  { %494 = vadd.xlane.f32.xlu1 %v493_v16  ;;  %454 = vadd.xlane.f32.xlu0 %v453_v17 }
  0xfc   :  { %497 = vadd.xlane.f32.xlu1 %v496_v1  ;;  %457 = vadd.xlane.f32.xlu0 %v456_v22 }
 0x100   :  { %500 = vadd.xlane.f32.xlu1 %v499_v27  ;;  %460 = vadd.xlane.f32.xlu0 %v459_v28 }
 0x104   :  { %503 = vadd.xlane.f32.xlu1 %v502_v31  ;;  %464 = vadd.xlane.f32.xlu0 %v463_v32 }
 0x15d   :  { %v431_v33 = vpop.xlane.xlu1 %430  ;;  %v428_v34 = vpop.xlane.xlu0 %427 }
 0x15e   :  { %v508_v48 = vadd.f32 %v1272_v47, %v431_v33  ;;  %v507_v51 = vadd.f32 %v1272_v47, %v428_v34 }
 0x160   :  { %v534_v62 = vmax.f32 %v508_v48, 0.0  ;;  %v533_v63 = vmax.f32 %v507_v51, 0.0 }
 0x161   :  { %v471_v35 = vpop.xlane.xlu1 %470  ;;  %v468_v36 = vpop.xlane.xlu0 %467 }
 0x162   :  { %v521_v55 = vadd.f32 %v1272_v47, %v471_v35  ;;  %v520_v56 = vadd.f32 %v1272_v47, %v468_v36  ;;  %v592_v16 = vrot.slane %v534_v62, %v1044_v42  ;;  %v588_v17 = vrot.slane %v533_v63, %v1042_v41 }
 0x164   :  { %v547_v0 = vmax.f32 %v521_v55, 0.0  ;;  %v546_v5 = vmax.f32 %v520_v56, 0.0  ;;  %v593_v29 = vsel %vm233_vm2, %v592_v16, %v588_v17 }
 0x165   :  { %v474_v37 = vpop.xlane.xlu1 %473  ;;  %v434_v38 = vpop.xlane.xlu0 %433 }
 0x166   :  { %v522_v59 = vadd.f32 %v1272_v47, %v474_v37  ;;  %v509_v61 = vadd.f32 %v1272_v47, %v434_v38  ;;  %v656_v18 = vrot.slane %v547_v0, %v1044_v42  ;;  %v652_v19 = vrot.slane %v546_v5, %v1042_v41 }
 0x168   :  { %v548_v10 = vmax.f32 %v522_v59, 0.0  ;;  %v535_v11 = vmax.f32 %v509_v61, 0.0  ;;  %v657_v42 = vsel %vm233_vm2, %v656_v18, %v652_v19  ;;  %vm771_vm2 = vcmask 7168  }
 0x169   :  { %v477_v39 = vpop.xlane.xlu1 %476  ;;  %v437_v40 = vpop.xlane.xlu0 %436 }
 0x16a   :  { %v523_v12 = vadd.f32 %v1272_v47, %v477_v39  ;;  %v510_v13 = vadd.f32 %v1272_v47, %v437_v40  ;;  %v661_v1 = vrot.slane %v548_v10, %v1046_v43  ;;  %v597_v22 = vrot.slane %v535_v11, %v1046_v43 }
 0x16c   :  { %v549_v23 = vmax.f32 %v523_v12, 0.0  ;;  %v536_v24 = vmax.f32 %v510_v13, 0.0  ;;  %v662_v43 = vsel %vm240_vm3, %v661_v1, %v657_v42  ;;  %v598_v33 = vsel %vm240_vm3, %v597_v22, %v593_v29 }
 0x16d   :  { %v480_v44 = vpop.xlane.xlu1 %479  ;;  %v440_v3 = vpop.xlane.xlu0 %439  ;;  %vm773_vm3 = vcmask 9216  }
 0x16e   :  { %v524_v14 = vadd.f32 %v1272_v47, %v480_v44  ;;  %v511_v15 = vadd.f32 %v1272_v47, %v440_v3  ;;  %v666_v34 = vrot.slane %v549_v23, %v1048_v45  ;;  %v602_v35 = vrot.slane %v536_v24, %v1048_v45 }
 0x170   :  { %v550_v27 = vmax.f32 %v524_v14, 0.0  ;;  %v537_v28 = vmax.f32 %v511_v15, 0.0 }
 0x171   :  { %v483_v46 = vpop.xlane.xlu1 %482  ;;  %v443_v4 = vpop.xlane.xlu0 %442 }
 0x172   :  { %v525_v25 = vadd.f32 %v1272_v47, %v483_v46  ;;  %v512_v26 = vadd.f32 %v1272_v47, %v443_v4  ;;  %v671_v40 = vrot.slane %v550_v27, %v1054_v49  ;;  %v607_v44 = vrot.slane %v537_v28, %v1054_v49 }
 0x174   :  { %v551_v36 = vmax.f32 %v525_v25, 0.0  ;;  %v538_v37 = vmax.f32 %v512_v26, 0.0 }
 0x175   :  { %v486_v57 = vpop.xlane.xlu1 %485  ;;  %v446_v58 = vpop.xlane.xlu0 %445 }
 0x176   :  { %v526_v41 = vadd.f32 %v1272_v47, %v486_v57  ;;  %v513_v30 = vadd.f32 %v1272_v47, %v446_v58  ;;  %v667_v57 = vsel %vm247_vm4, %v666_v34, %v662_v43  ;;  %v603_v58 = vsel %vm247_vm4, %v602_v35, %v598_v33 }
 0x177   :  { %v676_v61 = vrot.slane %v551_v36, %v1056_v50  ;;  %v612_v62 = vrot.slane %v538_v37, %v1056_v50  ;;  %v672_v5 = vsel %vm254_vm5, %v671_v40, %v667_v57  ;;  %v727_v57 = vstv %s793_s16 }
 0x178   :  { %v552_v4 = vmax.f32 %v526_v41, 0.0  ;;  %v539_v48 = vmax.f32 %v513_v30, 0.0 }
 0x179   :  { %v489_v6 = vpop.xlane.xlu1 %488  ;;  %v449_v7 = vpop.xlane.xlu0 %448 }
 0x17a   :  { %v527_v38 = vadd.f32 %v1272_v47, %v489_v6  ;;  %v514_v39 = vadd.f32 %v1272_v47, %v449_v7  ;;  %v608_v6 = vsel %vm254_vm5, %v607_v44, %v603_v58  ;;  %v681_v11 = vrot.slane %v552_v4, %v1058_v52 }
 0x17b   :  { %v617_v12 = vrot.slane %v539_v48, %v1058_v52  ;;  %v736_v58 = vstv %s796_s17 }
 0x17c   :  { %v553_v63 = vmax.f32 %v527_v38, 0.0  ;;  %v540_v0 = vmax.f32 %v514_v39, 0.0 }
 0x17d   :  { %v492_v20 = vpop.xlane.xlu1 %491  ;;  %v452_v21 = vpop.xlane.xlu0 %451 }
 0x17e   :  { %v528_v3 = vadd.f32 %v1272_v47, %v492_v20  ;;  %v515_v46 = vadd.f32 %v1272_v47, %v452_v21  ;;  %v677_v20 = vsel %vm261_vm6, %v676_v61, %v672_v5  ;;  %v613_v21 = vsel %vm261_vm6, %v612_v62, %v608_v6 }
 0x17f   :  { %v686_v1 = vrot.slane %v553_v63, %v1060_v53  ;;  %v622_v22 = vrot.slane %v540_v0, %v1060_v53  ;;  %v682_v26 = vsel %vm268_vm7, %v681_v11, %v677_v20  ;;  %v618_v27 = vsel %vm268_vm7, %v617_v12, %v613_v21 }
 0x180   :  { %v554_v7 = vmax.f32 %v528_v3, 0.0  ;;  %v541_v10 = vmax.f32 %v515_v46, 0.0  ;;  %v740_v63 = vstv %s797_s0  ;;  %v743_v0 = vstv %s798_s19 }
 0x181   :  { %v495_v31 = vpop.xlane.xlu1 %494  ;;  %v455_v32 = vpop.xlane.xlu0 %454  ;;  %v623_v43 = vsel %vm275_vm8, %v622_v22, %v618_v27  ;;  %v750_v5 = vstv %s800_s21  ;;  %v753_v6 = vstv %s801_s22 }
 0x182   :  { %v529_v51 = vadd.f32 %v1272_v47, %v495_v31  ;;  %v516_v45 = vadd.f32 %v1272_v47, %v455_v32  ;;  %v691_v52 = vrot.slane %v554_v7, %v1062_v54  ;;  %v627_v23 = vrot.slane %v541_v10, %v1062_v54 }
 0x183   :  { %v687_v32 = vsel %vm275_vm8, %v686_v1, %v682_v26 }
 0x184   :  { %v555_v13 = vmax.f32 %v529_v51, 0.0  ;;  %v542_v14 = vmax.f32 %v516_v45, 0.0  ;;  %v628_v35 = vsel %vm282_vm9, %v627_v23, %v623_v43  ;;  %v733_v45 = vstv %s732_s20 }
 0x185   :  { %v498_v55 = vpop.xlane.xlu1 %497  ;;  %v458_v56 = vpop.xlane.xlu0 %457 }
 0x186   :  { %v530_v59 = vadd.f32 %v1272_v47, %v498_v55  ;;  %v517_v49 = vadd.f32 %v1272_v47, %v458_v56  ;;  %v696_v28 = vrot.slane %v555_v13, %v1070_v60  ;;  %v632_v29 = vrot.slane %v542_v14, %v1070_v60 }
 0x187   :  { %v692_v60 = vsel %vm282_vm9, %v691_v52, %v687_v32 }
 0x188   :  { %v556_v17 = vmax.f32 %v530_v59, 0.0  ;;  %v543_v18 = vmax.f32 %v517_v49, 0.0  ;;  %v633_v38 = vsel %vm289_vm10, %v632_v29, %v628_v35 }
 0x189   :  { %v501_v15 = vpop.xlane.xlu1 %500  ;;  %v461_v16 = vpop.xlane.xlu0 %460 }
 0x18a   :  { %v531_v50 = vadd.f32 %v1272_v47, %v501_v15  ;;  %v518_v19 = vadd.f32 %v1272_v47, %v461_v16  ;;  %v701_v30 = vrot.slane %v556_v17, %v1076_v2  ;;  %v637_v53 = vrot.slane %v543_v18, %v1076_v2 }
 0x18b   :  { %v697_v2 = vsel %vm289_vm10, %v696_v28, %v692_v60  ;;  %v747_v15 = vstv %s799_s23  ;;  %v757_v16 = vstv %s802_s3 }
 0x18c   :  { %v557_v24 = vmax.f32 %v531_v50, 0.0  ;;  %v544_v25 = vmax.f32 %v518_v19, 0.0  ;;  %v638_v39 = vsel %vm296_vm11, %v637_v53, %v633_v38 }
 0x18d   :  { %v504_v42 = vpop.xlane.xlu1 %503  ;;  %v465_v41 = vpop.xlane.xlu0 %464 }
 0x18e   :  { %v532_v31 = vadd.f32 %v1272_v47, %v504_v42  ;;  %v519_v54 = vadd.f32 %v1272_v47, %v465_v41  ;;  %v706_v33 = vrot.slane %v557_v24, %v1088_v8  ;;  %v642_v34 = vrot.slane %v544_v25, %v1088_v8 }
 0x18f   :  { %v702_v47 = vsel %vm296_vm11, %v701_v30, %v697_v2 }
 0x190   :  { %v558_v36 = vmax.f32 %v532_v31, 0.0  ;;  %v545_v37 = vmax.f32 %v519_v54, 0.0  ;;  %v643_v8 = vsel %vm303_vm12, %v642_v34, %v638_v39  ;;  %v707_v3 = vsel %vm303_vm12, %v706_v33, %v702_v47 }
 0x192   :  { %v711_v40 = vrot.slane %v558_v36, %v1090_v9  ;;  %v647_v44 = vrot.slane %v545_v37, %v1090_v9  ;;  %v724_v9 = vstv %s723_s18 }
 0x194   :  { %v648_v46 = vsel %vm310_vm13, %v647_v44, %v643_v8  ;;  %v712_v4 = vsel %vm310_vm13, %v711_v40, %v707_v3 }
 0x195   :  { %v713_v48 = vsel %vm376_vm0, %v712_v4, %v648_v46 }
 0x196   :  { %v716_v51 = vsel %vm715_vm1, %v713_v48, 0.0 }
 0x197   :  { %717 = vadd.xlane.f32.xlu0 %v716_v51 }
 0x220   :  { %v718_v55 = vpop.xlane.xlu0 %717 }
 0x221   :  { %v720_v56 = vmul.f32 0.01, %v718_v55 }
 0x223   :  { %v725_v59 = vmul.f32 %v724_v9, %v720_v56  ;;  %v734_v49 = vmul.f32 %v733_v45, %v720_v56 }
 0x225   :  { %v728_v61 = vadd.f32 %v727_v57, %v725_v59  ;;  %v737_v62 = vadd.f32 %v736_v58, %v734_v49 }
 0x227   :  { %v729_v7 = vmax.f32 %v728_v61, 0.0  ;;  %v738_v10 = vmax.f32 %v737_v62, 0.0 }
 0x229   :  { %v741_v11 = vmul.f32 %v740_v63, %v729_v7  ;;  %v744_v12 = vmul.f32 %v743_v0, %v738_v10  ;;  %v751_v13 = vmul.f32 %v750_v5, %v729_v7  ;;  %v754_v14 = vmul.f32 %v753_v6, %v738_v10 }
 0x22b   :  { %v745_v17 = vadd.f32 %v744_v12, %v741_v11  ;;  %v755_v18 = vadd.f32 %v754_v14, %v751_v13 }
 0x22d   :  { %v748_v50 = vadd.f32 %v747_v15, %v745_v17  ;;  %v758_v19 = vadd.f32 %v757_v16, %v755_v18 }
 0x22f   :  { %v759_v20 = vmax.f32 %v748_v50, %v758_v19 }
 0x231   :  { %v760_v21 = vsub.f32 %v748_v50, %v759_v20  ;;  %v763_v1 = vsub.f32 %v758_v19, %v759_v20 }
 0x233   :  { %v761_v22 = vmul.f32 1.442695, %v760_v21  ;;  %v764_v52 = vmul.f32 1.442695, %v763_v1 }
 0x235   :  { %805 = vpow2.f32 %v761_v22 }
 0x236   :  { %807 = vpow2.f32 %v764_v52 }
 0x242   :  { %v806_v23 = vpop.eup %805 }
 0x243   :  { %v808_v24 = vpop.eup %807 }
 0x244   :  { %v766_v25 = vadd.f32 %v808_v24, %v806_v23 }
 0x246   :  { %809 = vrcp.f32 %v766_v25 }
 0x253   :  { %v810_v26 = vpop.eup %809 }
 0x254   :  { %v769_v27 = vmul.f32 %v810_v26, %v806_v23  ;;  %v770_v28 = vmul.f32 %v810_v26, %v808_v24 }
 0x256   :  { %v772_v29 = vsel %vm771_vm2, %v769_v27, %v770_v28 }
 0x257   :  { %774 = vst.msk [vmem:[#allocation5] sm:$0x3] %vm773_vm3, %v772_v29 }
 0x258   :  { %834 = shalt.err (!%p831_p9)
}
 0x259   :  { %784 = dma.vmem_to_hbm [thread:$0]  %s782_s25, 32, %s1357_s4, [#allocation3]  }
 0x25a   :  { %845 = dma.done.wait [#allocation3], 32  }
 0x25b   :  { %846 = vsyncadd [#allocation3], 4294967264 }
 0x25c   :  { %788 = vsyncpa [#allocation3], 1 }
 0x25d   :  { %789 = vsyncpa [#allocation4], 1 }

</bundles_post_ra>
